<compile_context>
chip_gen: v7x
topology: tpu7x:2x2x1
jax: 0.10.0
libtpu: 0.0.40
codegen_flags: <defaults>
</compile_context>

<pallas_src>
import functools

import jax
import jax.numpy as jnp
from jax.experimental import pallas as pl
from jax.experimental.pallas import tpu as pltpu


# Hidden sizes of the PyTorch module and their lane-padded (128-multiple) sizes.
H1, H2 = 400, 300
H1_PAD, H2_PAD = 512, 384


def _round_up(x, m):
    return (x + m - 1) // m * m


# ----------------------------------------------------------------------------
# Kernel: fused 3-layer MLP + softmax over (pre-masked) atom lanes.
# ----------------------------------------------------------------------------
def critic_kernel(xu_ref, w1_ref, b1_ref, w2_ref, b2_ref, w3_ref, b3_ref,
                  out_ref):
    # ---- layer 1 (single fused matmul, f32: K is only state_dim+action_dim) --
    h1 = jnp.dot(xu_ref[...], w1_ref[...], preferred_element_type=jnp.float32)
    h1 = jnp.maximum(h1 + b1_ref[...], 0.0)            # f32 epilogue (v5e-safe)

    # ---- layer 2 + relu (bf16 weights, f32 accumulation) ----
    h2 = jnp.dot(h1.astype(jnp.bfloat16), w2_ref[...],
                 preferred_element_type=jnp.float32)
    h2 = jnp.maximum(h2 + b2_ref[...], 0.0)

    # ---- layer 3 + softmax; padded atom lanes already hold -1e30 in b3 ----
    logits = jnp.dot(h2.astype(jnp.bfloat16), w3_ref[...],
                     preferred_element_type=jnp.float32)
    logits = logits + b3_ref[...]

    m = jnp.max(logits, axis=-1, keepdims=True)
    e = jnp.exp(logits - m)
    denom = jnp.sum(e, axis=-1, keepdims=True)
    out_ref[...] = e * (1.0 / denom)                    # exact normalization


# ----------------------------------------------------------------------------
# Wrapper: batch-tiled grid, VMEM-resident (constant-block) weights.
# ----------------------------------------------------------------------------
def critic_forward(x, u, params, num_atoms, *, num_tiles=1,
                   max_batch_tile=1024, trim=True):
    """num_tiles=1 is optimal for v5e/v6e (single TensorCore); use 2 on v7x."""
    w1, b1, w2, b2, w3, b3 = params
    xu = jnp.concatenate([x.astype(jnp.float32), u.astype(jnp.float32)],
                         axis=1)
    batch, in_dim = xu.shape
    atoms_pad = b3.shape[1]

    # Tile selection: pad is at most ~8*num_tiles rows (no blowup).
    b8 = _round_up(batch, 8)
    n = max(int(num_tiles), pl.cdiv(b8, max_batch_tile))
    tb = _round_up(pl.cdiv(b8, n), 8)
    n_steps = pl.cdiv(b8, tb)
    b_pad = tb * n_steps
    if b_pad != batch:
        xu = jnp.pad(xu, ((0, b_pad - batch), (0, 0)))

    tile = lambda i: (i, 0)      # batch-tiled operands
    const = lambda i: (0, 0)     # weights / biases: VMEM-resident across grid

    cost = pl.CostEstimate(
        flops=2 * b_pad * (in_dim * H1 + H1 * H2 + H2 * num_atoms),
        transcendentals=b_pad * atoms_pad,
        bytes_accessed=(xu.size + b_pad * atoms_pad) * 4
        + w1.size * 4 + (w2.size + w3.size) * 2
        + (b1.size + b2.size + b3.size) * 4,
    )

    out = pl.pallas_call(
        critic_kernel,
        out_shape=jax.ShapeDtypeStruct((b_pad, atoms_pad), jnp.float32),
        grid_spec=pltpu.PrefetchScalarGridSpec(
            num_scalar_prefetch=0,
            grid=(n_steps,),
            in_specs=[
                pl.BlockSpec((tb, in_dim), tile),
                pl.BlockSpec((in_dim, H1_PAD), const),
                pl.BlockSpec((1, H1_PAD), const),
                pl.BlockSpec((H1_PAD, H2_PAD), const),
                pl.BlockSpec((1, H2_PAD), const),
                pl.BlockSpec((H2_PAD, atoms_pad), const),
                pl.BlockSpec((1, atoms_pad), const),
            ],
            out_specs=pl.BlockSpec((tb, atoms_pad), tile),
        ),
        compiler_params=pltpu.CompilerParams(
            dimension_semantics=("parallel",)),  # v7x: shard batch across TCs
        cost_estimate=cost,
    )(xu, w1, b1, w2, b2, w3, b3)

    if trim:
        return out[:batch, :num_atoms]
    # Padded form: lane-dense (b_pad, 128); padded atom lanes are exactly 0.
    return out


# ----------------------------------------------------------------------------
# nn.Linear-style init. Weights stored as (in, out) == W^T, lane-padded.
# W1 stays f32 (tiny, keeps input precision); W2/W3 are bf16.  The atom mask is
# baked into b3: padded bias lanes hold -1e30.
# ----------------------------------------------------------------------------
def init_params(key, state_dim, action_dim, num_atoms):
    atoms_pad = _round_up(num_atoms, 128)

    def linear(k, fan_in, fan_out, out_pad, pad_bias_value=0.0):
        kw, kb = jax.random.split(k)
        bound = 1.0 / jnp.sqrt(fan_in)
        w = jax.random.uniform(kw, (fan_in, fan_out), jnp.float32,
                               minval=-bound, maxval=bound)
        b = jax.random.uniform(kb, (1, fan_out), jnp.float32,
                               minval=-bound, maxval=bound)
        w = jnp.pad(w, ((0, 0), (0, out_pad - fan_out)))
        b = jnp.pad(b, ((0, 0), (0, out_pad - fan_out)),
                    constant_values=pad_bias_value)
        return w, b

    k1, k2, k3 = jax.random.split(key, 3)
    w1, b1 = linear(k1, state_dim + action_dim, H1, H1_PAD)
    w2, b2 = linear(k2, H1, H2, H2_PAD)
    w3, b3 = linear(k3, H2, num_atoms, atoms_pad, pad_bias_value=-1e30)

    # Pad the contraction dims of W2/W3 to match the padded activations
    # (padded rows are zero => no effect on the result).
    w2 = jnp.pad(w2, ((0, H1_PAD - H1), (0, 0)))
    w3 = jnp.pad(w3, ((0, H2_PAD - H2), (0, 0)))

    # TODO(synk): optional int8 (v5e/v6e) / fp8 (v7x) W2 quantization for the
    # weight-DMA-bound small-batch regime; omitted to keep numerics simple.
    return (w1, b1,
            w2.astype(jnp.bfloat16), b2,
            w3.astype(jnp.bfloat16), b3)


def reference_forward(x, u, params, num_atoms):
    """Pure-JAX reference (f32 matmuls on the same padded weights)."""
    w1, b1, w2, b2, w3, b3 = params
    f32 = lambda a: a.astype(jnp.float32)
    xu = jnp.concatenate([x, u], axis=1)
    h1 = jnp.maximum(xu @ f32(w1) + b1, 0.0)
    h2 = jnp.maximum(h1 @ f32(w2) + b2, 0.0)
    logits = (h2 @ f32(w3) + b3)[:, :num_atoms]
    return jax.nn.softmax(logits, axis=-1)


if __name__ == "__main__":
    # hopper-medium-v2: state_dim=11, action_dim=3; C51 atoms=101.
    state_dim, action_dim, num_atoms = 11, 3, 101
    batch = 8

    key = jax.random.PRNGKey(0)
    kp, kx, ku = jax.random.split(key, 3)

    params = init_params(kp, state_dim, action_dim, num_atoms)
    x = jax.random.normal(kx, (batch, state_dim), jnp.float32)
    u = jax.random.normal(ku, (batch, action_dim), jnp.float32)

    out = jax.block_until_ready(critic_forward(x, u, params, num_atoms))

    # sanity: shape, softmax rows sum to 1, and agreement with f32 reference
    assert out.shape == (batch, num_atoms)
    assert jnp.allclose(jnp.sum(out, axis=-1), 1.0, atol=1e-3)
    ref = reference_forward(x, u, params, num_atoms)
    assert jnp.max(jnp.abs(out - ref)) < 5e-3

    print("KERNEL_OK")
</pallas_src>

<mosaic_0001>
module attributes {stable_mosaic.version = 11 : i64} {
  func.func @critic_kernel(%arg0: i32, %arg1: memref<8x14xf32, #tpu.memory_space<vmem>>, %arg2: memref<14x512xf32, #tpu.memory_space<vmem>>, %arg3: memref<1x512xf32, #tpu.memory_space<vmem>>, %arg4: memref<512x384xbf16, #tpu.memory_space<vmem>>, %arg5: memref<1x384xf32, #tpu.memory_space<vmem>>, %arg6: memref<384x128xbf16, #tpu.memory_space<vmem>>, %arg7: memref<1x128xf32, #tpu.memory_space<vmem>>, %arg8: memref<8x128xf32, #tpu.memory_space<vmem>>) attributes {dimension_semantics = [#tpu.dimension_semantics<parallel>], iteration_bounds = array<i64: 1>, scalar_prefetch = 0 : i64, scratch_operands = 0 : i64, tpu.core_type = #tpu.core_type<tc>, window_params = [{transform_indices = @transform_0, window_bounds = array<i64: 8, 14>}, {pipeline_mode = #tpu.pipeline_mode<synchronous>, transform_indices = @transform_1, window_bounds = array<i64: 14, 512>}, {pipeline_mode = #tpu.pipeline_mode<synchronous>, transform_indices = @transform_2, window_bounds = array<i64: 1, 512>}, {pipeline_mode = #tpu.pipeline_mode<synchronous>, transform_indices = @transform_3, window_bounds = array<i64: 512, 384>}, {pipeline_mode = #tpu.pipeline_mode<synchronous>, transform_indices = @transform_4, window_bounds = array<i64: 1, 384>}, {pipeline_mode = #tpu.pipeline_mode<synchronous>, transform_indices = @transform_5, window_bounds = array<i64: 384, 128>}, {pipeline_mode = #tpu.pipeline_mode<synchronous>, transform_indices = @transform_6, window_bounds = array<i64: 1, 128>}, {transform_indices = @transform_7, window_bounds = array<i64: 8, 128>}]} {
    %c0 = arith.constant 0 : index
    %c0_0 = arith.constant 0 : index
    %0 = vector.load %arg1[%c0, %c0_0] : memref<8x14xf32, #tpu.memory_space<vmem>>, vector<8x14xf32>
    %c0_1 = arith.constant 0 : index
    %c0_2 = arith.constant 0 : index
    %1 = vector.load %arg2[%c0_1, %c0_2] : memref<14x512xf32, #tpu.memory_space<vmem>>, vector<14x512xf32>
    %cst = arith.constant dense<0.000000e+00> : vector<8x512xf32>
    %2 = tpu.matmul %0, %1, %cst {dimension_numbers = #tpu.dot_dimension_numbers<[1], [0], [0], [1], [0, 0, 1, 1], [], []>} : vector<8x14xf32>, vector<14x512xf32>, vector<8x512xf32> -> vector<8x512xf32>
    %c0_3 = arith.constant 0 : index
    %c0_4 = arith.constant 0 : index
    %3 = vector.load %arg3[%c0_3, %c0_4] : memref<1x512xf32, #tpu.memory_space<vmem>>, vector<1x512xf32>
    %4 = vector.broadcast %3 : vector<1x512xf32> to vector<8x512xf32>
    %5 = arith.addf %2, %4 : vector<8x512xf32>
    %cst_5 = arith.constant 0.000000e+00 : f32
    %6 = vector.broadcast %cst_5 : f32 to vector<8x512xf32>
    %7 = arith.maximumf %5, %6 : vector<8x512xf32>
    %8 = arith.truncf %7 : vector<8x512xf32> to vector<8x512xbf16>
    %c0_6 = arith.constant 0 : index
    %c0_7 = arith.constant 0 : index
    %9 = vector.load %arg4[%c0_6, %c0_7] : memref<512x384xbf16, #tpu.memory_space<vmem>>, vector<512x384xbf16>
    %cst_8 = arith.constant dense<0.000000e+00> : vector<8x384xf32>
    %10 = tpu.matmul %8, %9, %cst_8 {dimension_numbers = #tpu.dot_dimension_numbers<[1], [0], [0], [1], [0, 0, 1, 1], [], []>} : vector<8x512xbf16>, vector<512x384xbf16>, vector<8x384xf32> -> vector<8x384xf32>
    %c0_9 = arith.constant 0 : index
    %c0_10 = arith.constant 0 : index
    %11 = vector.load %arg5[%c0_9, %c0_10] : memref<1x384xf32, #tpu.memory_space<vmem>>, vector<1x384xf32>
    %12 = vector.broadcast %11 : vector<1x384xf32> to vector<8x384xf32>
    %13 = arith.addf %10, %12 : vector<8x384xf32>
    %cst_11 = arith.constant 0.000000e+00 : f32
    %14 = vector.broadcast %cst_11 : f32 to vector<8x384xf32>
    %15 = arith.maximumf %13, %14 : vector<8x384xf32>
    %16 = arith.truncf %15 : vector<8x384xf32> to vector<8x384xbf16>
    %c0_12 = arith.constant 0 : index
    %c0_13 = arith.constant 0 : index
    %17 = vector.load %arg6[%c0_12, %c0_13] : memref<384x128xbf16, #tpu.memory_space<vmem>>, vector<384x128xbf16>
    %cst_14 = arith.constant dense<0.000000e+00> : vector<8x128xf32>
    %18 = tpu.matmul %16, %17, %cst_14 {dimension_numbers = #tpu.dot_dimension_numbers<[1], [0], [0], [1], [0, 0, 1, 1], [], []>} : vector<8x384xbf16>, vector<384x128xbf16>, vector<8x128xf32> -> vector<8x128xf32>
    %c0_15 = arith.constant 0 : index
    %c0_16 = arith.constant 0 : index
    %19 = vector.load %arg7[%c0_15, %c0_16] : memref<1x128xf32, #tpu.memory_space<vmem>>, vector<1x128xf32>
    %20 = vector.broadcast %19 : vector<1x128xf32> to vector<8x128xf32>
    %21 = arith.addf %18, %20 : vector<8x128xf32>
    %cst_17 = arith.constant dense<0xFF800000> : vector<8xf32>
    %22 = vector.multi_reduction <maximumf>, %21, %cst_17 [1] : vector<8x128xf32> to vector<8xf32>
    %23 = vector.shape_cast %22 : vector<8xf32> to vector<8x1xf32>
    %24 = vector.broadcast %23 : vector<8x1xf32> to vector<8x128xf32>
    %25 = arith.subf %21, %24 : vector<8x128xf32>
    %26 = math.exp %25 : vector<8x128xf32>
    %cst_18 = arith.constant dense<0.000000e+00> : vector<8xf32>
    %27 = vector.multi_reduction <add>, %26, %cst_18 [1] : vector<8x128xf32> to vector<8xf32>
    %28 = vector.shape_cast %27 : vector<8xf32> to vector<8x1xf32>
    %cst_19 = arith.constant 1.000000e+00 : f32
    %29 = vector.broadcast %cst_19 : f32 to vector<8x1xf32>
    %30 = arith.divf %29, %28 : vector<8x1xf32>
    %31 = vector.broadcast %30 : vector<8x1xf32> to vector<8x128xf32>
    %32 = arith.mulf %26, %31 : vector<8x128xf32>
    %c0_20 = arith.constant 0 : index
    %c0_21 = arith.constant 0 : index
    %33 = vector.load %arg8[%c0_20, %c0_21] : memref<8x128xf32, #tpu.memory_space<vmem>>, vector<8x128xf32>
    tpu.vector_store %arg8[%c0_20, %c0_21], %32 {strides = array<i32>} : memref<8x128xf32, #tpu.memory_space<vmem>>, vector<8x128xf32>,
    return
  }
  func.func @transform_0(%arg0: i32) -> (i32, i32) {
    %c0_i32 = arith.constant 0 : i32
    %c0_i32_0 = arith.constant 0 : i32
    return %arg0, %c0_i32 : i32, i32
  }
  func.func @transform_1(%arg0: i32) -> (i32, i32) {
    %c0_i32 = arith.constant 0 : i32
    %c0_i32_0 = arith.constant 0 : i32
    %c0_i32_1 = arith.constant 0 : i32
    return %c0_i32, %c0_i32_0 : i32, i32
  }
  func.func @transform_2(%arg0: i32) -> (i32, i32) {
    %c0_i32 = arith.constant 0 : i32
    %c0_i32_0 = arith.constant 0 : i32
    %c0_i32_1 = arith.constant 0 : i32
    return %c0_i32, %c0_i32_0 : i32, i32
  }
  func.func @transform_3(%arg0: i32) -> (i32, i32) {
    %c0_i32 = arith.constant 0 : i32
    %c0_i32_0 = arith.constant 0 : i32
    %c0_i32_1 = arith.constant 0 : i32
    return %c0_i32, %c0_i32_0 : i32, i32
  }
  func.func @transform_4(%arg0: i32) -> (i32, i32) {
    %c0_i32 = arith.constant 0 : i32
    %c0_i32_0 = arith.constant 0 : i32
    %c0_i32_1 = arith.constant 0 : i32
    return %c0_i32, %c0_i32_0 : i32, i32
  }
  func.func @transform_5(%arg0: i32) -> (i32, i32) {
    %c0_i32 = arith.constant 0 : i32
    %c0_i32_0 = arith.constant 0 : i32
    %c0_i32_1 = arith.constant 0 : i32
    return %c0_i32, %c0_i32_0 : i32, i32
  }
  func.func @transform_6(%arg0: i32) -> (i32, i32) {
    %c0_i32 = arith.constant 0 : i32
    %c0_i32_0 = arith.constant 0 : i32
    %c0_i32_1 = arith.constant 0 : i32
    return %c0_i32, %c0_i32_0 : i32, i32
  }
  func.func @transform_7(%arg0: i32) -> (i32, i32) {
    %c0_i32 = arith.constant 0 : i32
    %c0_i32_0 = arith.constant 0 : i32
    return %arg0, %c0_i32 : i32, i32
  }
}

</mosaic_0001>

<bundles_post_ra>
// kernel: tpu_custom_call.1
= control target key start
LH: loop header
LB: loop body
LE: loop exit
PB: predicated region body
PF: predicated region fallthrough
CT: control target
= control target key end

     0   :  { %12 = vsyncpa [#allocation3], 0  ;;  %s2103_s0 = inlined_call_operand.hbm [shape: f32[8,14], index: 0, kind: input, shape index: {}]   ;;  %s2104_s1 = inlined_call_operand.hbm [shape: f32[14,512], index: 1, kind: input, shape index: {}]   ;;  %s2105_s2 = inlined_call_operand.vmem [shape: f32[1,512], index: 2, kind: input, shape index: {}]   ;;  %s2106_s3 = inlined_call_operand.hbm [shape: bf16[512,384], index: 3, kind: input, shape index: {}]   ;;  %s2107_s4 = inlined_call_operand.vmem [shape: f32[1,384], index: 4, kind: input, shape index: {}]   ;;  %s2108_s5 = inlined_call_operand.hbm [shape: bf16[384,128], index: 5, kind: input, shape index: {}]   ;;  %s2109_s6 = inlined_call_operand.vmem [shape: f32[1,128], index: 6, kind: input, shape index: {}]   ;;  %s2110_s7 = inlined_call_operand.hbm [shape: f32[8,128], index: 7, kind: output, shape index: {}]  }
   0x1   :  { %13 = vsyncpa [#allocation6], 0 }
   0x2   :  { %14 = vsyncpa [#allocation9], 0 }
   0x3   :  { %15 = vsyncpa [#allocation4], 0  ;;  %s1939_s24 = smov [#allocation5]   ;;  %s1821_s28 = scalar_lea.hbm %s2104_s1, 1024 }
   0x4   :  { %s31_s25 = sshll.u32 %s1939_s24, 4  ;;  %p1822_p0 = scmp.ne.s32.totalorder %s2104_s1, %s1821_s28  ;;  %s32_s25 = int_to_ptr.vmem [resolvable:$true] %s31_s25 }
   0x5   :  { %p1825_p1 = scmp.lt.u32.totalorder %s1821_s28, %s2104_s1 }
   0x7   :  { %p1827_p2 = pnand %p1825_p1, %p1822_p0 }
   0x9   :  { %1830 = shalt.err (!%p1827_p2)
}
   0xa   :  { %s1831_s10 = scalar_lea.vmem %s32_s25, 1024  ;;  %p1836_p4 = scmp.lt.s32.totalorder %s32_s25, %s32_s25 }
   0xb   :  { %p1832_p3 = scmp.ne.s32.totalorder %s32_s25, %s1831_s10  ;;  %p1837_p5 = scmp.lt.s32.totalorder %s1831_s10, %s1831_s10 }
   0xd   :  { %p1838_p6 = por %p1837_p5, %p1836_p4 }
   0xf   :  { %p1839_p7 = pnand %p1838_p6, %p1832_p3 }
  0x11   :  { %1842 = shalt.err (!%p1839_p7)
}
  0x12   :  { %s1940_s11 = smov 512   ;;  %s1941_s12 = smov 32  }
  0x13   :  { %37 = dma.hbm_to_vmem [thread:$0]  %s2104_s1, 1024, %s32_s25, [#allocation6], %s1940_s11, %s1940_s11, %s1941_s12  }
  0x14   :  { %s1942_s15 = smov [#allocation2]   ;;  %s1943_s17 = smov [#allocation7]  }
  0x15   :  { %s22_s16 = sshll.u32 %s1942_s15, 4  ;;  %s45_s18 = sshll.u32 %s1943_s17, 4  ;;  %s23_s16 = int_to_ptr.vmem [resolvable:$true] %s22_s16  ;;  %s46_s18 = int_to_ptr.vmem [resolvable:$true] %s45_s18 }
  0x16   :  { %s1843_s21 = scalar_lea.hbm %s2103_s0, 128 }
  0x17   :  { %p1844_p8 = scmp.ne.s32.totalorder %s2103_s0, %s1843_s21  ;;  %p1847_p9 = scmp.lt.u32.totalorder %s1843_s21, %s2103_s0 }
  0x19   :  { %p1849_p10 = pnand %p1847_p9, %p1844_p8 }
  0x1b   :  { %1852 = shalt.err (!%p1849_p10)
}
  0x1c   :  { %s1853_s1 = scalar_lea.vmem %s23_s16, 128  ;;  %p1858_p12 = scmp.lt.s32.totalorder %s23_s16, %s23_s16 }
  0x1d   :  { %p1854_p11 = scmp.ne.s32.totalorder %s23_s16, %s1853_s1  ;;  %p1859_p13 = scmp.lt.s32.totalorder %s1853_s1, %s1853_s1 }
  0x1f   :  { %p1860_p0 = por %p1859_p13, %p1858_p12 }
  0x21   :  { %p1861_p1 = pnand %p1860_p0, %p1854_p11 }
  0x23   :  { %1864 = shalt.err (!%p1861_p1)
}
  0x24   :  { %25 = dma.hbm_to_vmem [thread:$0]  %s2103_s0, 128, %s23_s16, [#allocation3]  }
  0x25   :  { %s1865_s30 = scalar_lea.hbm %s2106_s3, 12288 }
  0x26   :  { %p1866_p2 = scmp.ne.s32.totalorder %s2106_s3, %s1865_s30  ;;  %p1869_p3 = scmp.lt.u32.totalorder %s1865_s30, %s2106_s3 }
  0x28   :  { %p1871_p4 = pnand %p1869_p3, %p1866_p2 }
  0x2a   :  { %1874 = shalt.err (!%p1871_p4)
}
  0x2b   :  { %s1875_s12 = scalar_lea.vmem %s46_s18, 12288  ;;  %p1880_p6 = scmp.lt.s32.totalorder %s46_s18, %s46_s18 }
  0x2c   :  { %p1876_p5 = scmp.ne.s32.totalorder %s46_s18, %s1875_s12  ;;  %p1881_p7 = scmp.lt.s32.totalorder %s1875_s12, %s1875_s12 }
  0x2e   :  { %p1882_p8 = por %p1881_p7, %p1880_p6 }
  0x30   :  { %p1883_p9 = pnand %p1882_p8, %p1876_p5 }
  0x32   :  { %1886 = shalt.err (!%p1883_p9)
}
  0x33   :  { %s1944_s0 = smov 192   ;;  %s1945_s13 = smov 12  }
  0x34   :  { %51 = dma.hbm_to_vmem [thread:$0]  %s2106_s3, 12288, %s46_s18, [#allocation6], %s1944_s0, %s1944_s0, %s1945_s13  }
  0x35   :  { %s1946_s16 = smov [#allocation8]   ;;  %s1887_s21 = scalar_lea.hbm %s2108_s5, 3072 }
  0x36   :  { %s59_s17 = sshll.u32 %s1946_s16, 4  ;;  %p1888_p10 = scmp.ne.s32.totalorder %s2108_s5, %s1887_s21  ;;  %s60_s17 = int_to_ptr.vmem [resolvable:$true] %s59_s17 }
  0x37   :  { %p1891_p11 = scmp.lt.u32.totalorder %s1887_s21, %s2108_s5 }
  0x39   :  { %p1893_p12 = pnand %p1891_p11, %p1888_p10 }
  0x3b   :  { %1896 = shalt.err (!%p1893_p12)
}
  0x3c   :  { %s1897_s1 = scalar_lea.vmem %s60_s17, 3072  ;;  %p1902_p0 = scmp.lt.s32.totalorder %s60_s17, %s60_s17 }
  0x3d   :  { %p1898_p13 = scmp.ne.s32.totalorder %s60_s17, %s1897_s1  ;;  %p1903_p1 = scmp.lt.s32.totalorder %s1897_s1, %s1897_s1 }
  0x3f   :  { %p1904_p2 = por %p1903_p1, %p1902_p0 }
  0x41   :  { %p1905_p3 = pnand %p1904_p2, %p1898_p13 }
  0x43   :  { %1908 = shalt.err (!%p1905_p3)
}
  0x44   :  { %s1947_s3 = smov 64   ;;  %s1948_s18 = smov 4  }
  0x45   :  { %65 = dma.hbm_to_vmem [thread:$0]  %s2108_s5, 3072, %s60_s17, [#allocation9], %s1947_s3, %s1947_s3, %s1948_s18  }
  0x46   :  { %1931 = dma.done.wait [#allocation3], 128  }
  0x47   :  { %1932 = vsyncadd [#allocation3], 4294967168 }
  0x48   :  { %1933 = dma.done.wait [#allocation6], 13312  }
  0x49   :  { %1934 = vsyncadd [#allocation6], 4294953984 }
  0x4a   :  { %1935 = dma.done.wait [#allocation9], 3072  }
  0x4b   :  { %1936 = vsyncadd [#allocation9], 4294964224  ;;  %v1949_v0 = vmov 0.0   ;;  %vm116_vm0 = vcmask 1045504   ;;  %vm1950_vm1 = vmmov 1   ;;  %v83_v2 = vld [vmem:[#allocation5 + $0x8] sm:$0xff] }
  0x4c   :  { %193 = vmatprep.mubr.f32.mxu0 %v1949_v0  ;;  %264 = vmatprep.mubr.f32.mxu1 %v1949_v0  ;;  %vm2043_vm2 = vmpackc.low %vm116_vm0, %vm1950_vm1  ;;  %v87_v3 = vld [vmem:[#allocation5 + $0x28] sm:$0x3f]  ;;  %v82_v4 = vld [vmem:[#allocation5] sm:$0xff]  ;;  %vm112_vm3 = vcmask 113664   ;;  %vm1951_vm4 = vmmov 0   ;;  %s1952_s8 = smov [#allocation10]  }
  0x4d   :  { %v1633_v5 = vpack.c.bf16 %v87_v3, %v83_v2  ;;  %v86_v6 = vld [vmem:[#allocation5 + $0x20] sm:$0x3f]  ;;  %v85_v7 = vld [vmem:[#allocation5 + $0x18] sm:$0xff]  ;;  %v84_v11 = vld [vmem:[#allocation5 + $0x10] sm:$0xff]  ;;  %v92_v2 = vlaneseq  ;;  %s1400_s9 = sshll.u32 %s1952_s8, 4  ;;  %s1401_s9 = int_to_ptr.vmem [resolvable:$true] %s1400_s9 }
  0x4e   :  { %v1636_v8 = vpack.c.bf16 %v86_v6, %v82_v4  ;;  %v81_v9 = vld [vmem:[#allocation2] sm:$0xff]  ;;  %v88_v12 = vld [vmem:[#allocation5 + $0x30] sm:$0x3f]  ;;  %v1665_v15 = vld [vmem:[#allocation7] ss:$12 sps:$4 sm:$0xff]   ;;  %p1914_p5 = scmp.lt.s32.totalorder %s1401_s9, %s1401_s9 }
  0x4f   :  { %v89_v10 = vld [vmem:[#allocation5 + $0x38] sm:$0x3f]  ;;  %1635 = vmatprep.subr.msk.bf16.mxu0 %vm2043_vm2, %v1633_v5  ;;  %v1642_v14 = vpack.c.bf16 %v88_v12, %v84_v11  ;;  %v1667_v16 = vld [vmem:[#allocation7 + $0x4] ss:$12 sps:$4 sm:$0xff]   ;;  %v1673_v19 = vld [vmem:[#allocation7 + $0x34] ss:$12 sps:$4 sm:$0xff]  }
  0x50   :  { %v1639_v13 = vpack.c.bf16 %v89_v10, %v85_v7  ;;  %1638 = vmatpush1.bf16.msk.msra.mxu0 %vm2043_vm2, %v1636_v8  ;;  %v1670_v17 = vld [vmem:[#allocation7 + $0x1c] ss:$12 sps:$4 sm:$0xff]   ;;  %v1668_v18 = vld [vmem:[#allocation7 + $0x18] ss:$12 sps:$4 sm:$0xff]   ;;  %v1677_v26 = vld [vmem:[#allocation7 + $0x60] ss:$12 sps:$4 sm:$0xff]  }
  0x51   :  { %936 = vmatprep.subr.bf16.mxu0 %v1667_v16  ;;  %v1671_v20 = vld [vmem:[#allocation7 + $0x30] ss:$12 sps:$4 sm:$0xff]   ;;  %v1676_v21 = vld [vmem:[#allocation7 + $0x4c] ss:$12 sps:$4 sm:$0xff]   ;;  %v1674_v22 = vld [vmem:[#allocation7 + $0x48] ss:$12 sps:$4 sm:$0xff]  }
  0x52   :  { %1641 = vmatprep.subr.msk.bf16.mxu1 %vm2043_vm2, %v1639_v13  ;;  %v1692_v23 = vld [vmem:[#allocation7 + $0xc8] ss:$12 sps:$4 sm:$0xff]   ;;  %v1679_v25 = vld [vmem:[#allocation7 + $0x64] ss:$12 sps:$4 sm:$0xff]   ;;  %v1697_v27 = vld [vmem:[#allocation7 + $0xe0] ss:$12 sps:$4 sm:$0xff]  }
  0x53   :  { %1644 = vmatpush1.bf16.msk.msra.mxu1 %vm2043_vm2, %v1642_v14  ;;  %1413 = vmatmul.mubr.msk.f32.vlgmr.msra.gmra.mrb[0].mxu0 %vm112_vm3, %v81_v9  ;;  %v1693_v24 = vld [vmem:[#allocation7 + $0x8] ss:$12 sps:$4 sm:$0xff]   ;;  %v1698_v28 = vld [vmem:[#allocation7 + $0x20] ss:$12 sps:$4 sm:$0xff]   ;;  %v1702_v30 = vld [vmem:[#allocation7 + $0xf8] ss:$12 sps:$4 sm:$0xff]  }
  0x54   :  { %937 = vmatpush1.bf16.msra.mxu0 %v1665_v15  ;;  %1538 = vmatprep.subr.bf16.mxu1 %v1692_v23  ;;  %v1682_v29 = vld [vmem:[#allocation7 + $0x7c] ss:$12 sps:$4 sm:$0xff]   ;;  %v1703_v31 = vld [vmem:[#allocation7 + $0x38] ss:$12 sps:$4 sm:$0xff]   ;;  %v1685_v33 = vld [vmem:[#allocation7 + $0x94] ss:$12 sps:$4 sm:$0xff]  }
  0x55   :  { %938 = vmatprep.subr.bf16.mxu0 %v1670_v17  ;;  %v1680_v32 = vld [vmem:[#allocation7 + $0x78] ss:$12 sps:$4 sm:$0xff]   ;;  %v1707_v34 = vld [vmem:[#allocation7 + $0x110] ss:$12 sps:$4 sm:$0xff]   ;;  %v1712_v38 = vld [vmem:[#allocation7 + $0x128] ss:$12 sps:$4 sm:$0xff]  }
  0x56   :  { %1416 = vmatmul.mubr.msk.f32.vlgmr.msra.gmra.mrb[0].mxu1 %vm112_vm3, %v81_v9  ;;  %v1708_v35 = vld [vmem:[#allocation7 + $0x50] ss:$12 sps:$4 sm:$0xff]   ;;  %v1688_v37 = vld [vmem:[#allocation7 + $0xac] ss:$12 sps:$4 sm:$0xff]   ;;  %v1713_v39 = vld [vmem:[#allocation7 + $0x68] ss:$12 sps:$4 sm:$0xff]  }
  0x57   :  { %1539 = vmatpush3.bf16.msra.mxu1 %v1693_v24  ;;  %v1683_v36 = vld [vmem:[#allocation7 + $0x90] ss:$12 sps:$4 sm:$0xff]   ;;  %v1686_v40 = vld [vmem:[#allocation7 + $0xa8] ss:$12 sps:$4 sm:$0xff]   ;;  %v1717_v41 = vld [vmem:[#allocation7 + $0x140] ss:$12 sps:$4 sm:$0xff]  }
  0x58   :  { %939 = vmatpush1.bf16.msra.mxu0 %v1668_v18  ;;  %1540 = vmatprep.subr.bf16.mxu1 %v1697_v27  ;;  %v1691_v42 = vld [vmem:[#allocation7 + $0xc4] ss:$12 sps:$4 sm:$0xff]   ;;  %v1718_v43 = vld [vmem:[#allocation7 + $0x80] ss:$12 sps:$4 sm:$0xff]   ;;  %v1696_v45 = vld [vmem:[#allocation7 + $0xdc] ss:$12 sps:$4 sm:$0xff]  }
  0x59   :  { %940 = vmatprep.subr.bf16.mxu0 %v1673_v19  ;;  %v1689_v44 = vld [vmem:[#allocation7 + $0xc0] ss:$12 sps:$4 sm:$0xff]   ;;  %v1694_v46 = vld [vmem:[#allocation7 + $0xd8] ss:$12 sps:$4 sm:$0xff]   ;;  %v1699_v48 = vld [vmem:[#allocation7 + $0xf0] ss:$12 sps:$4 sm:$0xff]  }
  0x5a   :  { %v1701_v47 = vld [vmem:[#allocation7 + $0xf4] ss:$12 sps:$4 sm:$0xff]   ;;  %v1706_v49 = vld [vmem:[#allocation7 + $0x10c] ss:$12 sps:$4 sm:$0xff]   ;;  %v1711_v51 = vld [vmem:[#allocation7 + $0x124] ss:$12 sps:$4 sm:$0xff]  }
  0x5b   :  { %1541 = vmatpush3.bf16.msra.mxu1 %v1698_v28  ;;  %v1704_v50 = vld [vmem:[#allocation7 + $0x108] ss:$12 sps:$4 sm:$0xff]   ;;  %v1709_v52 = vld [vmem:[#allocation7 + $0x120] ss:$12 sps:$4 sm:$0xff]   ;;  %v1714_v54 = vld [vmem:[#allocation7 + $0x138] ss:$12 sps:$4 sm:$0xff]  }
  0x5c   :  { %941 = vmatpush1.bf16.msra.mxu0 %v1671_v20  ;;  %1542 = vmatprep.subr.bf16.mxu1 %v1702_v30  ;;  %v1716_v53 = vld [vmem:[#allocation7 + $0x13c] ss:$12 sps:$4 sm:$0xff]   ;;  %v1721_v55 = vld [vmem:[#allocation7 + $0x154] ss:$12 sps:$4 sm:$0xff]   ;;  %v1722_v56 = vld [vmem:[#allocation7 + $0x158] ss:$12 sps:$4 sm:$0xff]  }
  0x5d   :  { %942 = vmatprep.subr.bf16.mxu0 %v1676_v21  ;;  %v1719_v57 = vld [vmem:[#allocation7 + $0x150] ss:$12 sps:$4 sm:$0xff]   ;;  %v1723_v58 = vld [vmem:[#allocation7 + $0x98] ss:$12 sps:$4 sm:$0xff]   ;;  %v1724_v61 = vld [vmem:[#allocation7 + $0x168] ss:$12 sps:$4 sm:$0xff]  }
  0x5e   :  { %v1726_v59 = vld [vmem:[#allocation7 + $0x16c] ss:$12 sps:$4 sm:$0xff]   ;;  %v1727_v60 = vld [vmem:[#allocation7 + $0x170] ss:$12 sps:$4 sm:$0xff]   ;;  %v1732_v1 = vld [vmem:[#allocation7 + $0x248] ss:$12 sps:$4 sm:$0xff]  }
  0x5f   :  { %1543 = vmatpush3.bf16.msra.mxu1 %v1703_v31  ;;  %v1728_v62 = vld [vmem:[#allocation7 + $0xb0] ss:$12 sps:$4 sm:$0xff]   ;;  %v2055_v3 = vshrl.u32 %v92_v2, 7  ;;  %v90_v5 = vld [vmem:[%s2105_s2] sm:$0xf] }
  0x60   :  { %943 = vmatpush1.bf16.msra.mxu0 %v1674_v22  ;;  %1544 = vmatprep.subr.bf16.mxu1 %v1707_v34  ;;  %v1731_v63 = vld [vmem:[#allocation7 + $0x184] ss:$12 sps:$4 sm:$0xff]   ;;  %v1729_v21 = vld [vmem:[#allocation7 + $0x180] ss:$12 sps:$4 sm:$0xff]   ;;  %v1733_v22 = vld [vmem:[#allocation7 + $0x188] ss:$12 sps:$4 sm:$0xff]  }
  0x61   :  { %944 = vmatprep.subr.bf16.mxu0 %v1679_v25  ;;  %v94_v4 = vsub.s32 0, %v2055_v3  ;;  %v98_v6 = vsub.s32 1, %v2055_v3  ;;  %v106_v7 = vsub.s32 3, %v2055_v3  ;;  %v1736_v25 = vld [vmem:[#allocation7 + $0x19c] ss:$12 sps:$4 sm:$0xff]  }
  0x62   :  { %v1734_v28 = vld [vmem:[#allocation7 + $0x198] ss:$12 sps:$4 sm:$0xff]   ;;  %v1741_v30 = vld [vmem:[#allocation7 + $0x1b4] ss:$12 sps:$4 sm:$0xff]  }
  0x63   :  { %1545 = vmatpush3.bf16.msra.mxu1 %v1708_v35  ;;  %v95_v8 = vrot.slane %v90_v5, %v94_v4  ;;  %v99_v9 = vrot.slane %v90_v5, %v98_v6  ;;  %v107_v11 = vrot.slane %v90_v5, %v106_v7  ;;  %v1742_v31 = vld [vmem:[#allocation7 + $0x278] ss:$12 sps:$4 sm:$0xff]   ;;  %v1747_v35 = vld [vmem:[#allocation7 + $0x290] ss:$12 sps:$4 sm:$0xff]  }
  0x64   :  { %945 = vmatpush1.bf16.msra.mxu0 %v1677_v26  ;;  %1546 = vmatprep.subr.bf16.mxu1 %v1712_v38  ;;  %v1737_v26 = vld [vmem:[#allocation7 + $0x260] ss:$12 sps:$4 sm:$0xff]   ;;  %v1751_v38 = vld [vmem:[#allocation7 + $0x1e4] ss:$12 sps:$4 sm:$0xff]  }
  0x65   :  { %946 = vmatprep.subr.bf16.mxu0 %v1682_v29  ;;  %v1738_v29 = vld [vmem:[#allocation7 + $0x1a0] ss:$12 sps:$4 sm:$0xff]   ;;  %v1783_v7 = vld [vmem:[#allocation7 + $0x2a4] ss:$12 sps:$4 sm:$0xff]  }
  0x66   :  { %v1746_v34 = vld [vmem:[#allocation7 + $0x1cc] ss:$12 sps:$4 sm:$0xff]  }
  0x67   :  { %1547 = vmatpush3.bf16.msra.mxu1 %v1713_v39  ;;  %v1752_v39 = vld [vmem:[#allocation7 + $0x2a8] ss:$12 sps:$4 sm:$0xff]   ;;  %v1780_v2 = vld [vmem:[#allocation7 + $0x28c] ss:$12 sps:$4 sm:$0xff]  }
  0x68   :  { %947 = vmatpush1.bf16.msra.mxu0 %v1680_v32  ;;  %1548 = vmatprep.subr.bf16.mxu1 %v1717_v41  ;;  %v1739_v32 = vld [vmem:[#allocation7 + $0x1b0] ss:$12 sps:$4 sm:$0xff]   ;;  %v1749_v41 = vld [vmem:[#allocation7 + $0x1e0] ss:$12 sps:$4 sm:$0xff]  }
  0x69   :  { %948 = vmatprep.subr.bf16.mxu0 %v1685_v33  ;;  %v1743_v33 = vld [vmem:[#allocation7 + $0x1b8] ss:$12 sps:$4 sm:$0xff]  }
  0x6b   :  { %1549 = vmatpush3.bf16.msra.mxu1 %v1718_v43  ;;  %v1756_v43 = vld [vmem:[#allocation7 + $0x1fc] ss:$12 sps:$4 sm:$0xff]  }
  0x6c   :  { %949 = vmatpush1.bf16.msra.mxu0 %v1683_v36  ;;  %1550 = vmatprep.subr.bf16.mxu1 %v1722_v56  ;;  %v1744_v36 = vld [vmem:[#allocation7 + $0x1c8] ss:$12 sps:$4 sm:$0xff]  }
  0x6d   :  { %950 = vmatprep.subr.bf16.mxu0 %v1688_v37  ;;  %v1748_v37 = vld [vmem:[#allocation7 + $0x1d0] ss:$12 sps:$4 sm:$0xff]   ;;  %v1764_v56 = vld [vmem:[#allocation7 + $0x228] ss:$12 sps:$4 sm:$0xff]  }
  0x6f   :  { %1551 = vmatpush3.bf16.msra.mxu1 %v1723_v58  ;;  %v1771_v58 = vld [vmem:[#allocation7 + $0x244] ss:$12 sps:$4 sm:$0xff]  }
  0x70   :  { %951 = vmatpush1.bf16.msra.mxu0 %v1686_v40  ;;  %1552 = vmatprep.subr.bf16.mxu1 %v1727_v60  ;;  %v102_v40 = vsub.s32 2, %v2055_v3  ;;  %v1769_v60 = vld [vmem:[#allocation7 + $0x240] ss:$12 sps:$4 sm:$0xff]   ;;  %v1811_v3 = vld [vmem:[#allocation8 + $0x90] sm:$0xff]  }
  0x71   :  { %952 = vmatprep.subr.bf16.mxu0 %v1691_v42  ;;  %v1753_v42 = vld [vmem:[#allocation7 + $0x1e8] ss:$12 sps:$4 sm:$0xff]  }
  0x73   :  { %1553 = vmatpush3.bf16.msra.mxu1 %v1728_v62  ;;  %v1772_v62 = vld [vmem:[#allocation7 + $0x258] ss:$12 sps:$4 sm:$0xff]  }
  0x74   :  { %953 = vmatpush1.bf16.msra.mxu0 %v1689_v44  ;;  %1560 = vmatprep.subr.bf16.mxu1 %v1732_v1  ;;  %v1757_v44 = vld [vmem:[#allocation7 + $0x2c0] ss:$12 sps:$4 sm:$0xff]   ;;  %v1775_v1 = vld [vmem:[#allocation7 + $0x270] ss:$12 sps:$4 sm:$0xff]  }
  0x75   :  { %954 = vmatprep.subr.bf16.mxu0 %v1696_v45  ;;  %v103_v45 = vrot.slane %v90_v5, %v102_v40  ;;  %v1778_v5 = vld [vmem:[#allocation7 + $0x288] ss:$12 sps:$4 sm:$0xff]  }
  0x78   :  { %955 = vmatpush1.bf16.msra.mxu0 %v1694_v46  ;;  %v1754_v46 = vld [vmem:[#allocation7 + $0x1f8] ss:$12 sps:$4 sm:$0xff]  }
  0x79   :  { %956 = vmatprep.subr.bf16.mxu0 %v1701_v47  ;;  %v1758_v47 = vld [vmem:[#allocation7 + $0x200] ss:$12 sps:$4 sm:$0xff]  }
  0x7c   :  { %957 = vmatpush1.bf16.msra.mxu0 %v1699_v48  ;;  %v1761_v48 = vld [vmem:[#allocation7 + $0x214] ss:$12 sps:$4 sm:$0xff]  }
  0x7d   :  { %958 = vmatprep.subr.bf16.mxu0 %v1706_v49  ;;  %v1762_v49 = vld [vmem:[#allocation7 + $0x2d8] ss:$12 sps:$4 sm:$0xff]  }
  0x80   :  { %959 = vmatpush1.bf16.msra.mxu0 %v1704_v50 }
  0x81   :  { %960 = vmatprep.subr.bf16.mxu0 %v1711_v51  ;;  %v1759_v51 = vld [vmem:[#allocation7 + $0x210] ss:$12 sps:$4 sm:$0xff]  }
  0x84   :  { %961 = vmatpush1.bf16.msra.mxu0 %v1709_v52  ;;  %v1763_v52 = vld [vmem:[#allocation7 + $0x218] ss:$12 sps:$4 sm:$0xff]  }
  0x85   :  { %962 = vmatprep.subr.bf16.mxu0 %v1716_v53  ;;  %v1766_v53 = vld [vmem:[#allocation7 + $0x22c] ss:$12 sps:$4 sm:$0xff]  }
  0x88   :  { %963 = vmatpush1.bf16.msra.mxu0 %v1714_v54  ;;  %v1767_v54 = vld [vmem:[#allocation7 + $0x2f0] ss:$12 sps:$4 sm:$0xff]  }
  0x89   :  { %964 = vmatprep.subr.bf16.mxu0 %v1721_v55 }
  0x8c   :  { %965 = vmatpush1.bf16.msra.mxu0 %v1719_v57  ;;  %v1768_v57 = vld [vmem:[#allocation7 + $0x230] ss:$12 sps:$4 sm:$0xff]  }
  0x8d   :  { %966 = vmatprep.subr.bf16.mxu0 %v1726_v59 }
  0x90   :  { %967 = vmatpush1.bf16.msra.mxu0 %v1724_v61  ;;  %v1774_v61 = vld [vmem:[#allocation7 + $0x25c] ss:$12 sps:$4 sm:$0xff]  }
  0x91   :  { %977 = vmatprep.subr.bf16.mxu0 %v1731_v63  ;;  %v1777_v63 = vld [vmem:[#allocation7 + $0x274] ss:$12 sps:$4 sm:$0xff]  }
 0x126   :  { %v195_v10 = vpop.f32.mrb[0].mxu0 }
 0x127   :  { %v196_v12 = vadd.f32 %v195_v10, %v95_v8  ;;  %v197_v13 = vpop.f32.mrb[1].mxu0  ;;  %v1781_v8 = vld [vmem:[#allocation7 + $0x2a0] ss:$12 sps:$4 sm:$0xff]   ;;  %v1784_v10 = vld [vmem:[#allocation7 + $0x2b8] ss:$12 sps:$4 sm:$0xff]  }
 0x128   :  { %v198_v14 = vadd.f32 %v197_v13, %v99_v9  ;;  %v1786_v9 = vld [vmem:[#allocation7 + $0x2bc] ss:$12 sps:$4 sm:$0xff]   ;;  %v1792_v13 = vld [vmem:[#allocation7 + $0x2ec] ss:$12 sps:$4 sm:$0xff]  }
 0x129   :  { %v266_v15 = vpop.f32.mrb[0].mxu1  ;;  %v271_v16 = vmax.f32 %v196_v12, 0.0  ;;  %v1787_v12 = vld [vmem:[#allocation7 + $0x2d0] ss:$12 sps:$4 sm:$0xff]  }
 0x12a   :  { %v268_v17 = vpop.f32.mrb[1].mxu1  ;;  %v272_v18 = vmax.f32 %v198_v14, 0.0  ;;  %v267_v50 = vadd.f32 %v266_v15, %v103_v45  ;;  %v1790_v14 = vld [vmem:[#allocation7 + $0x2e8] ss:$12 sps:$4 sm:$0xff]   ;;  %v1793_v15 = vld [vmem:[#allocation8 + $0x40] sm:$0xff]  }
 0x12b   :  { %v269_v19 = vadd.f32 %v268_v17, %v107_v11  ;;  %v275_v24 = vpack.c.bf16 %v271_v16, %v271_v16  ;;  %v1789_v11 = vld [vmem:[#allocation7 + $0x2d4] ss:$12 sps:$4 sm:$0xff]   ;;  %v1795_v17 = vld [vmem:[#allocation8 + $0x48] sm:$0xff]  }
 0x12c   :  { %v276_v20 = vpack.c.bf16 %v272_v18, %v272_v18  ;;  %v273_v55 = vmax.f32 %v267_v50, 0.0  ;;  %v1794_v16 = vld [vmem:[#allocation8] sm:$0xff]   ;;  %v1796_v18 = vld [vmem:[#allocation8 + $0x8] sm:$0xff]  }
 0x12d   :  { %v274_v23 = vmax.f32 %v269_v19, 0.0  ;;  %v1797_v19 = vld [vmem:[#allocation8 + $0x50] sm:$0xff]  }
 0x12e   :  { %968 = vmatprep.mubr.bf16.mxu0 %v276_v20  ;;  %1050 = vmatprep.mubr.bf16.mxu1 %v276_v20  ;;  %v277_v59 = vpack.c.bf16 %v273_v55, %v273_v55  ;;  %v1798_v20 = vld [vmem:[#allocation8 + $0x10] sm:$0xff]  }
 0x12f   :  { %v278_v27 = vpack.c.bf16 %v274_v23, %v274_v23  ;;  %969 = vmatmul.mubr.bf16.vlgmr.msra.gmra.mrb[4].mxu0 %v275_v24  ;;  %1051 = vmatmul.mubr.bf16.vlgmr.msra.gmra.mrb[4].mxu1 %v275_v24  ;;  %v1801_v23 = vld [vmem:[#allocation8 + $0x60] sm:$0xff]  }
 0x130   :  { %978 = vmatpush1.bf16.msra.mxu0 %v1729_v21  ;;  %1561 = vmatpush3.bf16.msra.mxu1 %v1733_v22  ;;  %v1799_v21 = vld [vmem:[#allocation8 + $0x58] sm:$0xff]   ;;  %v1802_v24 = vld [vmem:[#allocation8 + $0x20] sm:$0xff]  }
 0x131   :  { %979 = vmatprep.subr.bf16.mxu0 %v1736_v25  ;;  %1562 = vmatprep.subr.bf16.mxu1 %v1737_v26  ;;  %v1800_v22 = vld [vmem:[#allocation8 + $0x18] sm:$0xff]   ;;  %v1803_v25 = vld [vmem:[#allocation8 + $0x68] sm:$0xff]  }
 0x132   :  { %1090 = vmatprep.mubr.bf16.mxu1 %v278_v27  ;;  %1009 = vmatprep.mubr.bf16.mxu0 %v278_v27  ;;  %v1804_v26 = vld [vmem:[#allocation8 + $0x28] sm:$0xff]   ;;  %v1805_v27 = vld [vmem:[#allocation8 + $0x70] sm:$0xff]  }
 0x134   :  { %980 = vmatpush1.bf16.msra.mxu0 %v1734_v28  ;;  %1563 = vmatpush3.bf16.msra.mxu1 %v1738_v29  ;;  %v1806_v28 = vld [vmem:[#allocation8 + $0x30] sm:$0xff]   ;;  %v1807_v29 = vld [vmem:[#allocation8 + $0x78] sm:$0xff]  }
 0x135   :  { %981 = vmatprep.subr.bf16.mxu0 %v1741_v30  ;;  %1564 = vmatprep.subr.bf16.mxu1 %v1742_v31  ;;  %v1808_v30 = vld [vmem:[#allocation8 + $0x38] sm:$0xff]  }
 0x138   :  { %982 = vmatpush1.bf16.msra.mxu0 %v1739_v32  ;;  %1565 = vmatpush3.bf16.msra.mxu1 %v1743_v33 }
 0x139   :  { %983 = vmatprep.subr.bf16.mxu0 %v1746_v34  ;;  %1566 = vmatprep.subr.bf16.mxu1 %v1747_v35 }
 0x13c   :  { %984 = vmatpush1.bf16.msra.mxu0 %v1744_v36  ;;  %1567 = vmatpush3.bf16.msra.mxu1 %v1748_v37  ;;  %v407_v36 = vld [vmem:[%s2107_s4] sm:$0x7] }
 0x13d   :  { %985 = vmatprep.subr.bf16.mxu0 %v1751_v38  ;;  %1568 = vmatprep.subr.bf16.mxu1 %v1752_v39  ;;  %v420_v37 = vrot.slane %v407_v36, %v102_v40 }
 0x140   :  { %986 = vmatpush1.bf16.msra.mxu0 %v1749_v41  ;;  %1569 = vmatpush3.bf16.msra.mxu1 %v1753_v42 }
 0x141   :  { %987 = vmatprep.subr.bf16.mxu0 %v1756_v43  ;;  %1570 = vmatprep.subr.bf16.mxu1 %v1757_v44 }
 0x144   :  { %988 = vmatpush1.bf16.msra.mxu0 %v1754_v46  ;;  %1571 = vmatpush3.bf16.msra.mxu1 %v1758_v47  ;;  %v412_v46 = vrot.slane %v407_v36, %v94_v4  ;;  %v416_v47 = vrot.slane %v407_v36, %v98_v6  ;;  %v1812_v4 = vld [vmem:[#allocation8 + $0x98] sm:$0xff]   ;;  %v1813_v6 = vld [vmem:[#allocation8 + $0xa0] sm:$0xff]  }
 0x145   :  { %989 = vmatprep.subr.bf16.mxu0 %v1761_v48  ;;  %1572 = vmatprep.subr.bf16.mxu1 %v1762_v49 }
 0x148   :  { %990 = vmatpush1.bf16.msra.mxu0 %v1759_v51  ;;  %1573 = vmatpush3.bf16.msra.mxu1 %v1763_v52 }
 0x149   :  { %991 = vmatprep.subr.bf16.mxu0 %v1766_v53  ;;  %1574 = vmatprep.subr.bf16.mxu1 %v1767_v54 }
 0x14c   :  { %992 = vmatpush1.bf16.msra.mxu0 %v1764_v56  ;;  %1575 = vmatpush3.bf16.msra.mxu1 %v1768_v57  ;;  %v1809_v56 = vld [vmem:[#allocation8 + $0x80] sm:$0xff]  }
 0x14d   :  { %993 = vmatprep.subr.bf16.mxu0 %v1771_v58  ;;  %1582 = vmatprep.subr.bf16.mxu1 %v1793_v15  ;;  %v1810_v58 = vld [vmem:[#allocation8 + $0x88] sm:$0xff]  }
 0x14f   :  { %1091 = vmatmul.mubr.bf16.vlgmr.msra.gmra.mrb[8].mxu1 %v277_v59 }
 0x150   :  { %994 = vmatpush1.bf16.msra.mxu0 %v1769_v60  ;;  %1583 = vmatpush3.bf16.msra.mxu1 %v1794_v16  ;;  %v1815_v60 = vld [vmem:[#allocation8 + $0xb0] sm:$0xff]  }
 0x151   :  { %995 = vmatprep.subr.bf16.mxu0 %v1774_v61  ;;  %1584 = vmatprep.subr.bf16.mxu1 %v1795_v17  ;;  %v1816_v61 = vld [vmem:[#allocation8 + $0xb8] sm:$0xff]  }
 0x154   :  { %996 = vmatpush1.bf16.msra.mxu0 %v1772_v62  ;;  %1585 = vmatpush3.bf16.msra.mxu1 %v1796_v18 }
 0x155   :  { %997 = vmatprep.subr.bf16.mxu0 %v1777_v63  ;;  %1586 = vmatprep.subr.bf16.mxu1 %v1797_v19 }
 0x158   :  { %998 = vmatpush1.bf16.msra.mxu0 %v1775_v1  ;;  %1587 = vmatpush3.bf16.msra.mxu1 %v1798_v20 }
 0x159   :  { %999 = vmatprep.subr.bf16.mxu0 %v1780_v2  ;;  %1588 = vmatprep.subr.bf16.mxu1 %v1799_v21 }
 0x15c   :  { %1000 = vmatpush1.bf16.msra.mxu0 %v1778_v5  ;;  %1589 = vmatpush3.bf16.msra.mxu1 %v1800_v22 }
 0x15d   :  { %1001 = vmatprep.subr.bf16.mxu0 %v1783_v7  ;;  %1590 = vmatprep.subr.bf16.mxu1 %v1801_v23 }
 0x160   :  { %1002 = vmatpush1.bf16.msra.mxu0 %v1781_v8  ;;  %1591 = vmatpush3.bf16.msra.mxu1 %v1802_v24 }
 0x161   :  { %1003 = vmatprep.subr.bf16.mxu0 %v1786_v9  ;;  %1592 = vmatprep.subr.bf16.mxu1 %v1803_v25  ;;  %v1513_v9 = vld [vmem:[%s2109_s6] ss:$0 sm:$0xff]  ;;  %s1909_s6 = scalar_lea.vmem %s1401_s9, 128 }
 0x162   :  { %p1910_p4 = scmp.ne.s32.totalorder %s1401_s9, %s1909_s6  ;;  %p1915_p6 = scmp.lt.s32.totalorder %s1909_s6, %s1909_s6 }
 0x164   :  { %1004 = vmatpush1.bf16.msra.mxu0 %v1784_v10  ;;  %1593 = vmatpush3.bf16.msra.mxu1 %v1804_v26  ;;  %p1916_p7 = por %p1915_p6, %p1914_p5 }
 0x165   :  { %1005 = vmatprep.subr.bf16.mxu0 %v1789_v11  ;;  %1594 = vmatprep.subr.bf16.mxu1 %v1805_v27 }
 0x166   :  { %p1917_p8 = pnand %p1916_p7, %p1910_p4 }
 0x168   :  { %1006 = vmatpush1.bf16.msra.mxu0 %v1787_v12  ;;  %1595 = vmatpush3.bf16.msra.mxu1 %v1806_v28 }
 0x169   :  { %1007 = vmatprep.subr.bf16.mxu0 %v1792_v13  ;;  %1596 = vmatprep.subr.bf16.mxu1 %v1807_v29 }
 0x16c   :  { %1008 = vmatpush1.bf16.msra.mxu0 %v1790_v14  ;;  %1597 = vmatpush3.bf16.msra.mxu1 %v1808_v30 }
 0x16d   :  { %1613 = vmatprep.subr.bf16.mxu1 %v1949_v0 }
 0x16f   :  { %1010 = vmatmul.mubr.bf16.vlgmr.msra.gmra.mrb[4].mxu0 %v277_v59  ;;  %v1814_v59 = vld [vmem:[#allocation8 + $0xa8] sm:$0xff]  }
 0x202   :  { %v1554_v31 = vpop.f32.mrb[4].mxu1 }
 0x203   :  { %v1555_v32 = vpop.f32.mrb[5].mxu1 }
 0x204   :  { %v1556_v33 = vadd.f32 %v1555_v32, %v1554_v31  ;;  %v1557_v34 = vpop.f32.mrb[6].mxu1 }
 0x205   :  { %v1558_v35 = vpop.f32.mrb[7].mxu1 }
 0x206   :  { %v1053_v41 = vadd.f32 %v1556_v33, %v420_v37 }
 0x222   :  { %v1576_v38 = vpop.f32.mrb[8].mxu1 }
 0x223   :  { %v1577_v39 = vpop.f32.mrb[9].mxu1 }
 0x224   :  { %v1578_v42 = vadd.f32 %v1577_v39, %v1576_v38  ;;  %v1579_v43 = vpop.f32.mrb[10].mxu1 }
 0x225   :  { %v1580_v44 = vpop.f32.mrb[11].mxu1 }
 0x226   :  { %v1093_v45 = vadd.f32 %v1578_v42, %v1053_v41 }
 0x228   :  { %v1100_v62 = vmax.f32 %v1093_v45, 0.0 }
 0x22a   :  { %v1103_v63 = vpack.c.bf16 %v1100_v62, %v1100_v62 }
 0x242   :  { %v1011_v48 = vpop.f32.mrb[4].mxu0 }
 0x243   :  { %v1645_v49 = vadd.f32 %v1011_v48, %v412_v46  ;;  %v1013_v50 = vpop.f32.mrb[5].mxu0 }
 0x244   :  { %v1646_v51 = vadd.f32 %v1013_v50, %v416_v47  ;;  %v1015_v52 = vpop.f32.mrb[6].mxu0 }
 0x245   :  { %v1098_v53 = vmax.f32 %v1645_v49, 0.0  ;;  %v1016_v40 = vpop.f32.mrb[7].mxu0 }
 0x246   :  { %v1099_v54 = vmax.f32 %v1646_v51, 0.0 }
 0x247   :  { %v1101_v57 = vpack.c.bf16 %v1098_v53, %v1098_v53 }
 0x248   :  { %v1102_v55 = vpack.c.bf16 %v1099_v54, %v1099_v54 }
 0x24a   :  { %1335 = vmatprep.mubr.bf16.mxu1 %v1102_v55 }
 0x24b   :  { %1336 = vmatmul.mubr.bf16.vlgmr.msra.gmra.mrb[12].mxu1 %v1101_v57 }
 0x24c   :  { %1614 = vmatpush3.bf16.msra.mxu1 %v1809_v56  ;;  %1629 = vmatprep.mubr.msk.bf16.mxu1 %vm1951_vm4, %v1949_v0 }
 0x24d   :  { %1615 = vmatprep.subr.bf16.mxu1 %v1949_v0 }
 0x250   :  { %1616 = vmatpush3.bf16.msra.mxu1 %v1810_v58 }
 0x251   :  { %1617 = vmatprep.subr.bf16.mxu1 %v1949_v0 }
 0x254   :  { %1618 = vmatpush3.bf16.msra.mxu1 %v1811_v3 }
 0x255   :  { %1619 = vmatprep.subr.bf16.mxu1 %v1949_v0 }
 0x258   :  { %1620 = vmatpush3.bf16.msra.mxu1 %v1812_v4 }
 0x259   :  { %1621 = vmatprep.subr.bf16.mxu1 %v1949_v0 }
 0x25c   :  { %1622 = vmatpush3.bf16.msra.mxu1 %v1813_v6 }
 0x25d   :  { %1623 = vmatprep.subr.bf16.mxu1 %v1949_v0 }
 0x260   :  { %1624 = vmatpush3.bf16.msra.mxu1 %v1814_v59 }
 0x261   :  { %1625 = vmatprep.subr.bf16.mxu1 %v1949_v0 }
 0x264   :  { %1626 = vmatpush3.bf16.msra.mxu1 %v1815_v60 }
 0x265   :  { %1627 = vmatprep.subr.bf16.mxu1 %v1949_v0 }
 0x268   :  { %1628 = vmatpush3.bf16.msra.mxu1 %v1816_v61 }
 0x26b   :  { %1630 = vmatmul.mubr.bf16.vlgmr.msra.gmra.mrb[16].mxu1 %v1103_v63 }
 0x31e   :  { %v1598_v1 = vpop.f32.mrb[12].mxu1 }
 0x31f   :  { %v1599_v2 = vpop.f32.mrb[13].mxu1 }
 0x320   :  { %v1600_v5 = vadd.f32 %v1599_v2, %v1598_v1  ;;  %v1601_v7 = vpop.f32.mrb[14].mxu1 }
 0x321   :  { %v1602_v8 = vpop.f32.mrb[15].mxu1 }
 0x322   :  { %v1338_v10 = vadd.f32 %v1600_v5, %v1513_v9 }
 0x33e   :  { %v1377_v11 = vpop.f32.mrb[16].mxu1 }
 0x33f   :  { %v1378_v12 = vadd.f32 %v1377_v11, %v1338_v10  ;;  %v1631_v13 = vpop.f32.mrb[17].mxu1 }
 0x340   :  { %v1380_v14 = vpop.f32.mrb[18].mxu1 }
 0x341   :  { %v1632_v15 = vpop.f32.mrb[19].mxu1  ;;  %1383 = vmax.xlane.f32.xlu0 %v1378_v12 }
 0x3ce   :  { %v1384_v0 = vpop.xlane.xlu0 %1383 }
 0x3cf   :  { %v1385_v16 = vsub.f32 %v1378_v12, %v1384_v0 }
 0x3d1   :  { %v1386_v17 = vmul.f32 1.442695, %v1385_v16 }
 0x3d3   :  { %1817 = vpow2.f32 %v1386_v17 }
 0x3dd   :  { %v1818_v18 = vpop.eup %1817 }
 0x3de   :  { %1388 = vadd.xlane.f32.xlu0 %v1818_v18 }
 0x46b   :  { %v1389_v19 = vpop.xlane.xlu0 %1388 }
 0x46c   :  { %1819 = vrcp.f32 %v1389_v19 }
 0x476   :  { %v1820_v20 = vpop.eup %1819 }
 0x477   :  { %v1392_v21 = vmul.f32 %v1820_v20, %v1818_v18 }
 0x479   :  { %1393 = vst [vmem:[#allocation10] sm:$0xff] %v1392_v21 }
 0x47a   :  { %1920 = shalt.err (!%p1917_p8)
}
 0x47b   :  { %s1921_s12 = scalar_lea.hbm %s2110_s7, 128 }
 0x47c   :  { %p1922_p9 = scmp.ne.s32.totalorder %s2110_s7, %s1921_s12  ;;  %p1925_p10 = scmp.lt.u32.totalorder %s1921_s12, %s2110_s7 }
 0x47e   :  { %p1927_p11 = pnand %p1925_p10, %p1922_p9 }
 0x480   :  { %1930 = shalt.err (!%p1927_p11)
}
 0x481   :  { %1403 = dma.vmem_to_hbm [thread:$0]  %s1401_s9, 128, %s2110_s7, [#allocation4]  }
 0x482   :  { %1937 = dma.done.wait [#allocation4], 128  }
 0x483   :  { %1938 = vsyncadd [#allocation4], 4294967168 }
 0x484   :  { %1407 = vsyncpa [#allocation3], 1 }
 0x485   :  { %1408 = vsyncpa [#allocation6], 1 }
 0x486   :  { %1409 = vsyncpa [#allocation9], 1 }
 0x487   :  { %1410 = vsyncpa [#allocation4], 1 }

</bundles_post_ra>
